<compile_context>
chip_gen: v7x
topology: tpu7x:2x2x1
jax: 0.10.0
libtpu: 0.0.40
codegen_flags: <defaults>
</compile_context>

<pallas_src>
import jax
import jax.numpy as jnp
from jax.experimental import pallas as pl
from jax.experimental.pallas import tpu as pltpu

LANE = 128     # vreg lane width
SUBLANE = 8    # f32 sublane width


def _round_up(n, m):
    return ((n + m - 1) // m) * m


def mlp_forward_kernel(x_ref, w1_ref, b1_ref, w2_ref, b2_ref, o_ref):
    # Fused Linear -> ReLU -> Linear on one (TB, d_in) batch tile.
    # Matmul operands in bf16 (MXU fast path on v6e/v7x), accumulate in f32.
    # Bias add + ReLU in f32 on the VPU (safe on v5e, native on v6e/v7x).
    x = x_ref[...].astype(jnp.bfloat16)                      # (TB, d_in)
    h = jnp.dot(x, w1_ref[...],
                preferred_element_type=jnp.float32)          # (TB, H_p) f32
    h = jnp.maximum(h + b1_ref[...], 0.0)                    # bias + ReLU, f32
    y = jnp.dot(h.astype(jnp.bfloat16), w2_ref[...],
                preferred_element_type=jnp.float32)          # (TB, D_out_p) f32
    y = y + b2_ref[...]
    o_ref[...] = y.astype(o_ref.dtype)                       # lane-dense store


def module_forward(x, w1, b1, w2, b2, *, d_out=None, tb=512, min_steps=2,
                   return_padded=False):
    """Pallas-backed equivalent of Module.forward(X) == self.net(X).

    Weights are stored with the hidden/output feature dims padded to lane
    multiples of 128 (see init_params) but W1 is kept UNPADDED along the
    contraction dim so X never has to be feature-padded.  Only the batch dim
    of X is padded.  `min_steps` guarantees at least that many grid steps so
    the pipeline can prefetch (use min_steps=4 on v7x megacore).
    """
    B, d_in = x.shape
    assert w1.shape[0] == d_in, "w1 must be stored unpadded along K"
    h_p = w1.shape[1]
    d_out_p = w2.shape[1]
    if d_out is None:
        d_out = d_out_p

    # Batch tile: as large as possible (512 hits ~85% of HBM roofline on the
    # measured tile-size curve) while keeping >= min_steps grid steps so the
    # BlockSpec pipeline still overlaps DMA with compute.
    b_sl = _round_up(B, SUBLANE)
    tb_cap = max(SUBLANE, _round_up(pl.cdiv(b_sl, min_steps), SUBLANE))
    tb = max(SUBLANE, min(tb, tb_cap, b_sl))
    b_pad = _round_up(b_sl, tb)

    # Only batch rows are padded (feature dim stays at the logical d_in).
    x_p = jnp.pad(x, ((0, b_pad - B), (0, 0))) if b_pad != B else x

    grid = (b_pad // tb,)

    itemsize = jnp.dtype(x.dtype).itemsize
    cost = pl.CostEstimate(
        flops=2 * b_pad * (d_in * h_p + h_p * d_out_p),
        transcendentals=0,
        bytes_accessed=(b_pad * d_in * itemsize
                        + w1.size * jnp.dtype(w1.dtype).itemsize
                        + b1.size * jnp.dtype(b1.dtype).itemsize
                        + w2.size * jnp.dtype(w2.dtype).itemsize
                        + b2.size * jnp.dtype(b2.dtype).itemsize
                        + b_pad * d_out_p * itemsize),
    )

    # Weights/biases are revisited every grid step -> single resident buffer.
    resident = pl.Buffered(1)

    out_p = pl.pallas_call(
        mlp_forward_kernel,
        out_shape=jax.ShapeDtypeStruct((b_pad, d_out_p), x.dtype),
        grid_spec=pltpu.PrefetchScalarGridSpec(
            num_scalar_prefetch=0,
            grid=grid,
            in_specs=[
                # X: one batch tile per grid step (double-buffered by Pallas);
                # last dim equals the full array dim, so no lane padding needed.
                pl.BlockSpec((tb, d_in), lambda i: (i, 0)),
                # Weights / biases: same block every step -> VMEM-resident,
                # single-buffered.
                pl.BlockSpec((d_in, h_p), lambda i: (0, 0),
                             pipeline_mode=resident),
                pl.BlockSpec((1, h_p), lambda i: (0, 0),
                             pipeline_mode=resident),
                pl.BlockSpec((h_p, d_out_p), lambda i: (0, 0),
                             pipeline_mode=resident),
                pl.BlockSpec((1, d_out_p), lambda i: (0, 0),
                             pipeline_mode=resident),
            ],
            out_specs=pl.BlockSpec((tb, d_out_p), lambda i: (i, 0)),
        ),
        compiler_params=pltpu.CompilerParams(
            # Batch tiles are independent -> shard across v7x's 2 TensorCores.
            dimension_semantics=("parallel",),
        ),
        cost_estimate=cost,
    )(x_p, w1, b1, w2, b2)

    if return_padded:
        # Skip the post-kernel slice copy when the consumer can work on the
        # padded (b_pad, d_out_p) lane-dense layout.
        return out_p
    return out_p[:B, :d_out]


def init_params(key, d_in, d_hidden, d_out):
    """PyTorch nn.Linear default init (uniform +/- 1/sqrt(fan_in)).

    W1 is stored UNPADDED along its contraction dim (d_in) so X never needs
    feature padding; hidden/output feature dims are zero-padded to lane
    multiples of 128 once here (not per call).  Weights are bf16 (MXU operand
    dtype); biases stay f32.
    """
    h_p = _round_up(d_hidden, LANE)
    d_out_p = _round_up(d_out, LANE)

    k1, k2, k3, k4 = jax.random.split(key, 4)
    lim1 = 1.0 / jnp.sqrt(jnp.float32(d_in))
    lim2 = 1.0 / jnp.sqrt(jnp.float32(d_hidden))

    w1 = jax.random.uniform(k1, (d_in, d_hidden), jnp.float32, -lim1, lim1)
    b1 = jax.random.uniform(k2, (1, d_hidden), jnp.float32, -lim1, lim1)
    w2 = jax.random.uniform(k3, (d_hidden, d_out), jnp.float32, -lim2, lim2)
    b2 = jax.random.uniform(k4, (1, d_out), jnp.float32, -lim2, lim2)

    w1_p = jnp.pad(w1, ((0, 0), (0, h_p - d_hidden))).astype(jnp.bfloat16)
    b1_p = jnp.pad(b1, ((0, 0), (0, h_p - d_hidden)))                     # f32
    w2_p = jnp.pad(w2, ((0, h_p - d_hidden),
                        (0, d_out_p - d_out))).astype(jnp.bfloat16)
    b2_p = jnp.pad(b2, ((0, 0), (0, d_out_p - d_out)))                    # f32

    return (w1_p, b1_p, w2_p, b2_p), (w1, b1, w2, b2)


if __name__ == "__main__":
    key = jax.random.PRNGKey(0)
    k_x, k_p = jax.random.split(key)

    # Logical module shapes (small); batch big enough to exercise the grid
    # (tb policy gives 2 grid steps here -> pipeline overlap is exercised).
    B, D_in, H, D_out = 512, 32, 64, 16
    x = jax.random.normal(k_x, (B, D_in), jnp.float32)
    (w1p, b1p, w2p, b2p), (w1, b1, w2, b2) = init_params(k_p, D_in, H, D_out)

    out = module_forward(x, w1p, b1p, w2p, b2p, d_out=D_out,
                         tb=512, min_steps=2)
    out = jax.block_until_ready(out)
    assert out.shape == (B, D_out)

    # Reference 1: pure-JAX mirror of the kernel math (bf16 operands, f32
    # accumulation).  Slightly loose tolerance for MXU-vs-XLA summation order.
    h_ref = jnp.maximum(
        jnp.dot(x.astype(jnp.bfloat16), w1p,
                preferred_element_type=jnp.float32) + b1p, 0.0)
    ref_bf16 = (jnp.dot(h_ref.astype(jnp.bfloat16), w2p,
                        preferred_element_type=jnp.float32) + b2p)[:, :D_out]
    assert jnp.allclose(out, ref_bf16, atol=2e-3, rtol=2e-3)

    # Reference 2: original full-f32 module math (semantic fidelity check,
    # looser tolerance for the bf16 operand cast).
    ref_f32 = jnp.maximum(x @ w1 + b1, 0.0) @ w2 + b2
    assert jnp.allclose(out, ref_f32, atol=5e-2, rtol=5e-2)

    print("KERNEL_OK")
</pallas_src>

<mosaic_0001>
module attributes {stable_mosaic.version = 11 : i64} {
  func.func @mlp_forward_kernel(%arg0: i32, %arg1: memref<256x32xf32, #tpu.memory_space<vmem>>, %arg2: memref<32x128xbf16, #tpu.memory_space<vmem>>, %arg3: memref<1x128xf32, #tpu.memory_space<vmem>>, %arg4: memref<128x128xbf16, #tpu.memory_space<vmem>>, %arg5: memref<1x128xf32, #tpu.memory_space<vmem>>, %arg6: memref<256x128xf32, #tpu.memory_space<vmem>>) attributes {dimension_semantics = [#tpu.dimension_semantics<parallel>], iteration_bounds = array<i64: 2>, scalar_prefetch = 0 : i64, scratch_operands = 0 : i64, tpu.core_type = #tpu.core_type<tc>, window_params = [{transform_indices = @transform_0, window_bounds = array<i64: 256, 32>}, {pipeline_mode = #tpu.pipeline_mode<synchronous>, transform_indices = @transform_1, window_bounds = array<i64: 32, 128>}, {pipeline_mode = #tpu.pipeline_mode<synchronous>, transform_indices = @transform_2, window_bounds = array<i64: 1, 128>}, {pipeline_mode = #tpu.pipeline_mode<synchronous>, transform_indices = @transform_3, window_bounds = array<i64: 128, 128>}, {pipeline_mode = #tpu.pipeline_mode<synchronous>, transform_indices = @transform_4, window_bounds = array<i64: 1, 128>}, {transform_indices = @transform_5, window_bounds = array<i64: 256, 128>}]} {
    %c0 = arith.constant 0 : index
    %c0_0 = arith.constant 0 : index
    %0 = vector.load %arg1[%c0, %c0_0] : memref<256x32xf32, #tpu.memory_space<vmem>>, vector<256x32xf32>
    %1 = arith.truncf %0 : vector<256x32xf32> to vector<256x32xbf16>
    %c0_1 = arith.constant 0 : index
    %c0_2 = arith.constant 0 : index
    %2 = vector.load %arg2[%c0_1, %c0_2] : memref<32x128xbf16, #tpu.memory_space<vmem>>, vector<32x128xbf16>
    %cst = arith.constant dense<0.000000e+00> : vector<256x128xf32>
    %3 = tpu.matmul %1, %2, %cst {dimension_numbers = #tpu.dot_dimension_numbers<[1], [0], [0], [1], [0, 0, 1, 1], [], []>} : vector<256x32xbf16>, vector<32x128xbf16>, vector<256x128xf32> -> vector<256x128xf32>
    %c0_3 = arith.constant 0 : index
    %c0_4 = arith.constant 0 : index
    %4 = vector.load %arg3[%c0_3, %c0_4] : memref<1x128xf32, #tpu.memory_space<vmem>>, vector<1x128xf32>
    %5 = vector.broadcast %4 : vector<1x128xf32> to vector<256x128xf32>
    %6 = arith.addf %3, %5 : vector<256x128xf32>
    %cst_5 = arith.constant 0.000000e+00 : f32
    %7 = vector.broadcast %cst_5 : f32 to vector<256x128xf32>
    %8 = arith.maximumf %6, %7 : vector<256x128xf32>
    %9 = arith.truncf %8 : vector<256x128xf32> to vector<256x128xbf16>
    %c0_6 = arith.constant 0 : index
    %c0_7 = arith.constant 0 : index
    %10 = vector.load %arg4[%c0_6, %c0_7] : memref<128x128xbf16, #tpu.memory_space<vmem>>, vector<128x128xbf16>
    %cst_8 = arith.constant dense<0.000000e+00> : vector<256x128xf32>
    %11 = tpu.matmul %9, %10, %cst_8 {dimension_numbers = #tpu.dot_dimension_numbers<[1], [0], [0], [1], [0, 0, 1, 1], [], []>} : vector<256x128xbf16>, vector<128x128xbf16>, vector<256x128xf32> -> vector<256x128xf32>
    %c0_9 = arith.constant 0 : index
    %c0_10 = arith.constant 0 : index
    %12 = vector.load %arg5[%c0_9, %c0_10] : memref<1x128xf32, #tpu.memory_space<vmem>>, vector<1x128xf32>
    %13 = vector.broadcast %12 : vector<1x128xf32> to vector<256x128xf32>
    %14 = arith.addf %11, %13 : vector<256x128xf32>
    %c0_11 = arith.constant 0 : index
    %c0_12 = arith.constant 0 : index
    %15 = vector.load %arg6[%c0_11, %c0_12] : memref<256x128xf32, #tpu.memory_space<vmem>>, vector<256x128xf32>
    tpu.vector_store %arg6[%c0_11, %c0_12], %14 {strides = array<i32>} : memref<256x128xf32, #tpu.memory_space<vmem>>, vector<256x128xf32>,
    return
  }
  func.func @transform_0(%arg0: i32) -> (i32, i32) {
    %c0_i32 = arith.constant 0 : i32
    %c0_i32_0 = arith.constant 0 : i32
    return %arg0, %c0_i32 : i32, i32
  }
  func.func @transform_1(%arg0: i32) -> (i32, i32) {
    %c0_i32 = arith.constant 0 : i32
    %c0_i32_0 = arith.constant 0 : i32
    %c0_i32_1 = arith.constant 0 : i32
    return %c0_i32, %c0_i32_0 : i32, i32
  }
  func.func @transform_2(%arg0: i32) -> (i32, i32) {
    %c0_i32 = arith.constant 0 : i32
    %c0_i32_0 = arith.constant 0 : i32
    %c0_i32_1 = arith.constant 0 : i32
    return %c0_i32, %c0_i32_0 : i32, i32
  }
  func.func @transform_3(%arg0: i32) -> (i32, i32) {
    %c0_i32 = arith.constant 0 : i32
    %c0_i32_0 = arith.constant 0 : i32
    %c0_i32_1 = arith.constant 0 : i32
    return %c0_i32, %c0_i32_0 : i32, i32
  }
  func.func @transform_4(%arg0: i32) -> (i32, i32) {
    %c0_i32 = arith.constant 0 : i32
    %c0_i32_0 = arith.constant 0 : i32
    %c0_i32_1 = arith.constant 0 : i32
    return %c0_i32, %c0_i32_0 : i32, i32
  }
  func.func @transform_5(%arg0: i32) -> (i32, i32) {
    %c0_i32 = arith.constant 0 : i32
    %c0_i32_0 = arith.constant 0 : i32
    return %arg0, %c0_i32 : i32, i32
  }
}

</mosaic_0001>

<bundles_post_ra>
// kernel: tpu_custom_call.1
= control target key start
LH: loop header
LB: loop body
LE: loop exit
PB: predicated region body
PF: predicated region fallthrough
CT: control target
= control target key end

     0   :  { %10 = vsyncpa [#allocation3], 0  ;;  %s1522_s0 = inlined_call_operand.vmem [shape: f32[512,32], index: 0, kind: input, shape index: {}]   ;;  %s1523_s1 = inlined_call_operand.vmem [shape: bf16[32,128], index: 1, kind: input, shape index: {}]   ;;  %s1524_s2 = inlined_call_operand.vmem [shape: f32[1,128], index: 2, kind: input, shape index: {}]   ;;  %s1525_s3 = inlined_call_operand.vmem [shape: bf16[128,128], index: 3, kind: input, shape index: {}]   ;;  %s1526_s4 = inlined_call_operand.vmem [shape: f32[1,128], index: 4, kind: input, shape index: {}]   ;;  %s1527_s5 = inlined_call_operand.hbm [shape: f32[512,128], index: 5, kind: output, shape index: {}]  }
   0x1   :  { %12 = vsyncpa [#allocation3 + $0x1], 0  ;;  %s1227_s18 = smov 0   ;;  %s1229_s19 = smov 0  }
   0x2   :  { %s1231_s20 = smov 0   ;;  %s1233_s21 = smov 0  }
   0x3 LB: > { %s1248_s22 = sadd.s32 4294967295, %s1192_s21   ;;  %s896_s23 = sadd.s32 4294967294, %s1192_s21   ;;  %s1192_s21 = sphi %s1233_s21, %s1533_s21   ;;  %s1188_s20 = sphi %s1231_s20, %s1532_s20   ;;  %s1184_s19 = sphi %s1229_s19, %s1531_s19   ;;  %s1180_s18 = sphi %s1227_s18, %s1530_s18  }
   0x4   : > { %s1252_s24 = sadd.s32 1, %s1192_s21   ;;  %s135_s25 = sadd.s32 1, %s1188_s20 }
   0x5   : > { %s132_s26 = ssub.s32 %s1192_s21, %s1252_s24  ;;  %p145_p0 = scmp.ne.s32.totalorder %s1188_s20, %s1184_s19 }
   0x6   : > { %p133_p1 = scmp.eq.s32.totalorder %s132_s26, 0  ;;  %p146_p2 = scmp.eq.s32.totalorder %s1248_s22, 1 }
   0x7   : > { %p151_p3 = scmp.ne.s32.totalorder %s1184_s19, %s1180_s18  ;;  %p152_p4 = scmp.eq.s32.totalorder %s896_s23, 1 }
   0x8   : > { %s1263_s27 = scalar_select %p133_p1, %s1188_s20, %s135_s25  }
   0x9   : > { %p1265_p5 = por %p146_p2, %p145_p0  ;;  %p1269_p6 = por %p152_p4, %p151_p3 }
   0xa   : > { %p899_p7 = scmp.ge.s32.totalorder %s1192_s21, 1  ;;  %p191_p8 = scmp.lt.s32.totalorder %s1192_s21, 3 }
   0xc   : > { %p192_p9 = pnand %p899_p7, %p191_p8 }
   0xd   : > { %v1120_v0 = vld [vmem:[%s1523_s1] sm:$0xff] (!%p192_p9)   ;;  %s901_s7 = sshll.u32 (!%p192_p9), %s1248_s22, 5  ;;  %v1121_v1 = vld [vmem:[%s1523_s1 + $0x8] sm:$0xff] (!%p192_p9)   ;;  %v1124_v4 = vld [vmem:[%s1525_s3 + $0x10] sm:$0xff] (!%p192_p9)   ;;  %vm298_vm0 = vcmask (!%p192_p9), 261120   ;;  %s216_s16 = sand.u32 (!%p192_p9), 1, %s1184_s19  }
   0xe   : > { %195 = sbr.rel (%p192_p9) target bundleno = 538 (0x21a), region = 40  ;;  %p220_p10 = scmp.lt.s32.totalorder (!%p192_p9), %s901_s7, 63  ;;  %979 = vmatprep.subr.bf16.mxu0 (!%p192_p9), %v1120_v0  ;;  %v1122_v2 = vld [vmem:[%s1525_s3] sm:$0xff] (!%p192_p9)   ;;  %v1123_v3 = vld [vmem:[%s1525_s3 + $0x8] sm:$0xff] (!%p192_p9)   ;;  %v1125_v16 = vld [vmem:[%s1525_s3 + $0x18] sm:$0xff] (!%p192_p9)  }
   0xf   : > { %980 = vmatpush3.bf16.msra.mxu0 (!%p192_p9), %v1120_v0  ;;  %1063 = vmatprep.subr.bf16.mxu1 (!%p192_p9), %v1122_v2  ;;  %v1126_v21 = vld [vmem:[%s1525_s3 + $0x20] sm:$0xff] (!%p192_p9)   ;;  %v1127_v24 = vld [vmem:[%s1525_s3 + $0x28] sm:$0xff] (!%p192_p9)   ;;  %v1128_v56 = vld [vmem:[%s1525_s3 + $0x30] sm:$0xff] (!%p192_p9)   ;;  %s936_s30 = sshll.u32 (!%p192_p9), %s1248_s22, 12  ;;  %s1481_s22 = scalar_lea.sflag (!%p192_p9), [#allocation3], %s216_s16 }
  0x10   : > { %981 = vmatprep.subr.bf16.mxu0 (!%p192_p9), %v1121_v1  ;;  %1071 = vmatpush3.bf16.msra.mxu1 (!%p192_p9), %v1122_v2  ;;  %v1129_v57 = vld [vmem:[%s1525_s3 + $0x38] sm:$0xff] (!%p192_p9)   ;;  %v1362_v58 = vld [vmem:[%s1524_s2] ss:$0 sm:$0xff] (!%p192_p9)  ;;  %s1471_s9 = scalar_lea.hbm (!%p192_p9), %s1527_s5, %s936_s30  ;;  %s1194_s11 = smov (!%p192_p9), [#allocation2]  }
  0x11   : > { %1064 = vmatprep.subr.bf16.mxu1 (!%p192_p9), %v1123_v3  ;;  %s1134_s12 = sshll.u32 (!%p192_p9), %s1194_s11, 4  ;;  %s1135_s12 = int_to_ptr.vmem [resolvable:$false] %s1134_s12 }
  0x12   : > { %s1136_s13 = scalar_lea.vmem (!%p192_p9), %s1135_s12, 8192 }
  0x13   : > { %982 = vmatpush3.bf16.msra.mxu0 (!%p192_p9), %v1121_v1 }
  0x14   : > { %1015 = vmatprep.subr.bf16.mxu0 (!%p192_p9), %v1122_v2  ;;  %1072 = vmatpush3.bf16.msra.mxu1 (!%p192_p9), %v1123_v3 }
  0x15   : > { %s1535_s7 = smov (!%p220_p10, %s901_s7), 63  ;;  %1065 = vmatprep.subr.bf16.mxu1 %v1124_v4 }
  0x16   : > { %s902_s14 = sshll.u32 %s1535_s7, 3 }
  0x17   : > { %s1291_s17 = scalar_lea.vmem %s1522_s0, %s902_s14 }
  0x18   : > { %v227_v5 = vld [vmem:[%s1291_s17] sm:$0xff]  ;;  %v228_v6 = vld [vmem:[%s1291_s17 + $0x8] sm:$0xff]  ;;  %v229_v7 = vld [vmem:[%s1291_s17 + $0x10] sm:$0xff]  ;;  %1073 = vmatpush3.bf16.msra.mxu1 %v1124_v4 }
  0x19   : > { %v259_v8 = vpack.c.bf16 %v228_v6, %v227_v5  ;;  %v230_v9 = vld [vmem:[%s1291_s17 + $0x18] sm:$0xff]  ;;  %v231_v10 = vld [vmem:[%s1291_s17 + $0x20] sm:$0xff]  ;;  %v232_v11 = vld [vmem:[%s1291_s17 + $0x28] sm:$0xff]  ;;  %1066 = vmatprep.subr.bf16.mxu1 %v1125_v16 }
  0x1a   : > { %v260_v12 = vpack.c.bf16 %v230_v9, %v229_v7  ;;  %v261_v13 = vpack.c.bf16 %v232_v11, %v231_v10  ;;  %v233_v14 = vld [vmem:[%s1291_s17 + $0x30] sm:$0xff]  ;;  %v234_v15 = vld [vmem:[%s1291_s17 + $0x38] sm:$0xff]  ;;  %v235_v17 = vld [vmem:[%s1291_s17 + $0x40] sm:$0xff] }
  0x1b   : > { %983 = vmatprep.mubr.msk.bf16.mxu0 %vm298_vm0, %v259_v8  ;;  %v236_v18 = vld [vmem:[%s1291_s17 + $0x48] sm:$0xff]  ;;  %v262_v19 = vpack.c.bf16 %v234_v15, %v233_v14  ;;  %v237_v22 = vld [vmem:[%s1291_s17 + $0x50] sm:$0xff]  ;;  %v238_v23 = vld [vmem:[%s1291_s17 + $0x58] sm:$0xff] }
  0x1c   : > { %984 = vmatmul.mubr.msk.bf16.vlgmr.msra.gmra.mrb[0].mxu0 %vm298_vm0, %v260_v12  ;;  %v263_v20 = vpack.c.bf16 %v236_v18, %v235_v17  ;;  %1074 = vmatpush3.bf16.msra.mxu1 %v1125_v16  ;;  %v239_v25 = vld [vmem:[%s1291_s17 + $0x60] sm:$0xff]  ;;  %v240_v26 = vld [vmem:[%s1291_s17 + $0x68] sm:$0xff]  ;;  %v264_v27 = vpack.c.bf16 %v238_v23, %v237_v22  ;;  %v241_v29 = vld [vmem:[%s1291_s17 + $0x70] sm:$0xff] }
  0x1d   : > { %987 = vmatprep.mubr.msk.bf16.mxu0 %vm298_vm0, %v261_v13  ;;  %1016 = vmatpush3.bf16.msra.mxu0 %v1122_v2  ;;  %v265_v28 = vpack.c.bf16 %v240_v26, %v239_v25  ;;  %v242_v30 = vld [vmem:[%s1291_s17 + $0x78] sm:$0xff]  ;;  %v243_v31 = vld [vmem:[%s1291_s17 + $0x80] sm:$0xff]  ;;  %v244_v32 = vld [vmem:[%s1291_s17 + $0x88] sm:$0xff] }
  0x1e   : > { %1017 = vmatprep.subr.bf16.mxu0 %v1123_v3  ;;  %1067 = vmatprep.subr.bf16.mxu1 %v1126_v21  ;;  %v266_v33 = vpack.c.bf16 %v242_v30, %v241_v29  ;;  %v267_v34 = vpack.c.bf16 %v244_v32, %v243_v31  ;;  %v245_v35 = vld [vmem:[%s1291_s17 + $0x90] sm:$0xff]  ;;  %v246_v36 = vld [vmem:[%s1291_s17 + $0x98] sm:$0xff]  ;;  %v247_v37 = vld [vmem:[%s1291_s17 + $0xa0] sm:$0xff] }
  0x1f   : > { %v248_v38 = vld [vmem:[%s1291_s17 + $0xa8] sm:$0xff]  ;;  %v268_v39 = vpack.c.bf16 %v246_v36, %v245_v35  ;;  %v249_v41 = vld [vmem:[%s1291_s17 + $0xb0] sm:$0xff]  ;;  %v250_v42 = vld [vmem:[%s1291_s17 + $0xb8] sm:$0xff] }
  0x20   : > { %1075 = vmatpush3.bf16.msra.mxu1 %v1126_v21  ;;  %v269_v40 = vpack.c.bf16 %v248_v38, %v247_v37  ;;  %v251_v43 = vld [vmem:[%s1291_s17 + $0xc0] sm:$0xff]  ;;  %v252_v44 = vld [vmem:[%s1291_s17 + $0xc8] sm:$0xff]  ;;  %v270_v45 = vpack.c.bf16 %v250_v42, %v249_v41  ;;  %v253_v47 = vld [vmem:[%s1291_s17 + $0xd0] sm:$0xff] }
  0x21   : > { %1018 = vmatpush3.bf16.msra.mxu0 %v1123_v3  ;;  %1068 = vmatprep.subr.bf16.mxu1 %v1127_v24  ;;  %v271_v46 = vpack.c.bf16 %v252_v44, %v251_v43  ;;  %v254_v48 = vld [vmem:[%s1291_s17 + $0xd8] sm:$0xff]  ;;  %v255_v49 = vld [vmem:[%s1291_s17 + $0xe0] sm:$0xff]  ;;  %v256_v50 = vld [vmem:[%s1291_s17 + $0xe8] sm:$0xff] }
  0x22   : > { %1019 = vmatprep.subr.bf16.mxu0 %v1124_v4  ;;  %v272_v51 = vpack.c.bf16 %v254_v48, %v253_v47  ;;  %v273_v52 = vpack.c.bf16 %v256_v50, %v255_v49  ;;  %v257_v53 = vld [vmem:[%s1291_s17 + $0xf0] sm:$0xff]  ;;  %v258_v54 = vld [vmem:[%s1291_s17 + $0xf8] sm:$0xff]  ;;  %s900_s17 = sshll.u32 %s216_s16, 8 }
  0x23   : > { %v274_v55 = vpack.c.bf16 %v258_v54, %v257_v53  ;;  %s1406_s26 = scalar_lea.vmem [#allocation2], %s900_s17 }
  0x24   : > { %988 = vmatmul.mubr.msk.bf16.gmra.mrb[4].mxu0 %vm298_vm0, %v262_v19  ;;  %1076 = vmatpush3.bf16.msra.mxu1 %v1127_v24  ;;  %s834_s6 = sshll.u32 %s1406_s26, 4  ;;  %s1473_s6 = int_to_ptr.vmem [resolvable:$true] %s834_s6 }
  0x25   : > { %991 = vmatprep.mubr.msk.bf16.mxu0 %vm298_vm0, %v263_v20  ;;  %1020 = vmatpush3.bf16.msra.mxu0 %v1124_v4  ;;  %s1130_s10 = scalar_lea.vmem %s1473_s6, 4096  ;;  %p1137_p0 = scmp.lt.s32.totalorder %s1473_s6, %s1135_s12 }
  0x26   : > { %1021 = vmatprep.subr.bf16.mxu0 %v1125_v16  ;;  %1069 = vmatprep.subr.bf16.mxu1 %v1128_v56  ;;  %p1131_p11 = scmp.ne.s32.totalorder %s1473_s6, %s1130_s10  ;;  %p1138_p1 = scmp.lt.s32.totalorder %s1136_s13, %s1130_s10 }
  0x28   : > { %1077 = vmatpush3.bf16.msra.mxu1 %v1128_v56  ;;  %p1132_p12 = pnand %p1131_p11, %p1265_p5  ;;  %p1139_p2 = por %p1138_p1, %p1137_p0 }
  0x29   : > { %1022 = vmatpush3.bf16.msra.mxu0 %v1125_v16  ;;  %1070 = vmatprep.subr.bf16.mxu1 %v1129_v57 }
  0x2a   : > { %1023 = vmatprep.subr.bf16.mxu0 %v1126_v21  ;;  %p1133_p13 = pneg %p1132_p12 }
  0x2c   : > { %992 = vmatmul.mubr.msk.bf16.gmra.mrb[8].mxu0 %vm298_vm0, %v264_v27  ;;  %1078 = vmatpush3.bf16.msra.mxu1 %v1129_v57  ;;  %p1140_p3 = pnand %p1139_p2, %p1133_p13 }
  0x2d   : > { %995 = vmatprep.mubr.msk.bf16.mxu0 %vm298_vm0, %v265_v28  ;;  %1024 = vmatpush3.bf16.msra.mxu0 %v1126_v21 }
  0x2e   : > { %1025 = vmatprep.subr.bf16.mxu0 %v1127_v24 }
  0x31   : > { %1026 = vmatpush3.bf16.msra.mxu0 %v1127_v24 }
  0x32   : > { %1027 = vmatprep.subr.bf16.mxu0 %v1128_v56 }
  0x34   : > { %996 = vmatmul.mubr.msk.bf16.gmra.mrb[12].mxu0 %vm298_vm0, %v266_v33 }
  0x35   : > { %999 = vmatprep.mubr.msk.bf16.mxu0 %vm298_vm0, %v267_v34  ;;  %1028 = vmatpush3.bf16.msra.mxu0 %v1128_v56 }
  0x36   : > { %1029 = vmatprep.subr.bf16.mxu0 %v1129_v57 }
  0x39   : > { %1030 = vmatpush3.bf16.msra.mxu0 %v1129_v57 }
  0x3c   : > { %1000 = vmatmul.mubr.msk.bf16.gmra.mrb[16].mxu0 %vm298_vm0, %v268_v39 }
  0x3d   : > { %1003 = vmatprep.mubr.msk.bf16.mxu0 %vm298_vm0, %v269_v40 }
  0x44   : > { %1004 = vmatmul.mubr.msk.bf16.gmra.mrb[20].mxu0 %vm298_vm0, %v270_v45 }
  0x45   : > { %1007 = vmatprep.mubr.msk.bf16.mxu0 %vm298_vm0, %v271_v46 }
  0x4c   : > { %1008 = vmatmul.mubr.msk.bf16.gmra.mrb[24].mxu0 %vm298_vm0, %v272_v51 }
  0x4d   : > { %1011 = vmatprep.mubr.msk.bf16.mxu0 %vm298_vm0, %v273_v52 }
  0x54   : > { %1012 = vmatmul.mubr.msk.bf16.gmra.mrb[28].mxu0 %vm298_vm0, %v274_v55 }
  0xef   : > { %v985_v59 = vpop.f32.mrb[0].mxu0 }
  0xf0   : > { %v390_v60 = vadd.f32 %v985_v59, %v1362_v58  ;;  %v381_v61 = vpop.f32.mrb[1].mxu0 }
  0xf1   : > { %v382_v62 = vadd.f32 %v1362_v58, %v381_v61  ;;  %v986_v63 = vpop.f32.mrb[2].mxu0 }
  0xf2   : > { %v393_v0 = vadd.f32 %v986_v63, %v1362_v58  ;;  %v384_v1 = vpop.f32.mrb[3].mxu0  ;;  %v510_v3 = vmax.f32 %v390_v60, 0.0 }
  0xf3   : > { %v385_v2 = vadd.f32 %v1362_v58, %v384_v1  ;;  %v508_v5 = vmax.f32 %v382_v62, 0.0 }
  0xf4   : > { %v511_v4 = vmax.f32 %v393_v0, 0.0 }
  0xf5   : > { %v509_v6 = vmax.f32 %v385_v2, 0.0 }
  0xf6   : > { %v541_v7 = vpack.c.bf16 %v511_v4, %v510_v3 }
  0xf7   : > { %v540_v8 = vpack.c.bf16 %v509_v6, %v508_v5  ;;  %v989_v9 = vpop.f32.mrb[4].mxu0 }
  0xf8   : > { %v406_v10 = vadd.f32 %v989_v9, %v1362_v58  ;;  %v397_v11 = vpop.f32.mrb[5].mxu0 }
  0xf9   : > { %v398_v12 = vadd.f32 %v1362_v58, %v397_v11  ;;  %v990_v13 = vpop.f32.mrb[6].mxu0  ;;  %1031 = vmatprep.mubr.bf16.mxu0 %v540_v8 }
  0xfa   : > { %v409_v14 = vadd.f32 %v990_v13, %v1362_v58  ;;  %v400_v15 = vpop.f32.mrb[7].mxu0  ;;  %1032 = vmatmul.mubr.bf16.vlgmr.msra.gmra.mrb[32].mxu0 %v541_v7  ;;  %v514_v17 = vmax.f32 %v406_v10, 0.0 }
  0xfb   : > { %v401_v16 = vadd.f32 %v1362_v58, %v400_v15  ;;  %v512_v19 = vmax.f32 %v398_v12, 0.0 }
  0xfc   : > { %v515_v18 = vmax.f32 %v409_v14, 0.0 }
  0xfd   : > { %v513_v20 = vmax.f32 %v401_v16, 0.0 }
  0xfe   : > { %v543_v21 = vpack.c.bf16 %v515_v18, %v514_v17 }
  0xff   : > { %v993_v22 = vpop.f32.mrb[8].mxu0  ;;  %v542_v23 = vpack.c.bf16 %v513_v20, %v512_v19 }
 0x100   : > { %v422_v24 = vadd.f32 %v993_v22, %v1362_v58  ;;  %v413_v25 = vpop.f32.mrb[9].mxu0 }
 0x101   : > { %v414_v26 = vadd.f32 %v1362_v58, %v413_v25  ;;  %v994_v27 = vpop.f32.mrb[10].mxu0  ;;  %1035 = vmatprep.mubr.bf16.mxu1 %v542_v23 }
 0x102   : > { %v425_v28 = vadd.f32 %v994_v27, %v1362_v58  ;;  %v416_v29 = vpop.f32.mrb[11].mxu0  ;;  %1036 = vmatmul.mubr.bf16.vlgmr.msra.gmra.mrb[0].mxu1 %v543_v21  ;;  %v518_v31 = vmax.f32 %v422_v24, 0.0 }
 0x103   : > { %v417_v30 = vadd.f32 %v1362_v58, %v416_v29  ;;  %v516_v33 = vmax.f32 %v414_v26, 0.0 }
 0x104   : > { %v519_v32 = vmax.f32 %v425_v28, 0.0 }
 0x105   : > { %v517_v34 = vmax.f32 %v417_v30, 0.0 }
 0x106   : > { %v545_v35 = vpack.c.bf16 %v519_v32, %v518_v31 }
 0x107   : > { %v544_v36 = vpack.c.bf16 %v517_v34, %v516_v33  ;;  %v997_v37 = vpop.f32.mrb[12].mxu0 }
 0x108   : > { %v438_v38 = vadd.f32 %v997_v37, %v1362_v58  ;;  %v429_v39 = vpop.f32.mrb[13].mxu0 }
 0x109   : > { %v430_v40 = vadd.f32 %v1362_v58, %v429_v39  ;;  %v998_v41 = vpop.f32.mrb[14].mxu0  ;;  %1039 = vmatprep.mubr.bf16.mxu1 %v544_v36 }
 0x10a   : > { %v441_v42 = vadd.f32 %v998_v41, %v1362_v58  ;;  %v432_v43 = vpop.f32.mrb[15].mxu0  ;;  %1040 = vmatmul.mubr.bf16.gmra.mrb[4].mxu1 %v545_v35  ;;  %v522_v45 = vmax.f32 %v438_v38, 0.0 }
 0x10b   : > { %v433_v44 = vadd.f32 %v1362_v58, %v432_v43  ;;  %v520_v47 = vmax.f32 %v430_v40, 0.0 }
 0x10c   : > { %v523_v46 = vmax.f32 %v441_v42, 0.0 }
 0x10d   : > { %v521_v48 = vmax.f32 %v433_v44, 0.0  ;;  %v1402_v44 = vld [vmem:[%s1526_s4] ss:$0 sm:$0xff] }
 0x10e   : > { %v547_v49 = vpack.c.bf16 %v523_v46, %v522_v45 }
 0x10f   : > { %v546_v50 = vpack.c.bf16 %v521_v48, %v520_v47  ;;  %v1001_v51 = vpop.f32.mrb[16].mxu0 }
 0x110   : > { %v454_v52 = vadd.f32 %v1001_v51, %v1362_v58  ;;  %v445_v53 = vpop.f32.mrb[17].mxu0 }
 0x111   : > { %v446_v54 = vadd.f32 %v1362_v58, %v445_v53  ;;  %v1002_v55 = vpop.f32.mrb[18].mxu0  ;;  %1043 = vmatprep.mubr.bf16.mxu1 %v546_v50 }
 0x112   : > { %v457_v56 = vadd.f32 %v1002_v55, %v1362_v58  ;;  %v448_v57 = vpop.f32.mrb[19].mxu0  ;;  %1044 = vmatmul.mubr.bf16.gmra.mrb[8].mxu1 %v547_v49  ;;  %v526_v60 = vmax.f32 %v454_v52, 0.0 }
 0x113   : > { %v449_v59 = vadd.f32 %v1362_v58, %v448_v57  ;;  %v524_v62 = vmax.f32 %v446_v54, 0.0 }
 0x114   : > { %v527_v61 = vmax.f32 %v457_v56, 0.0 }
 0x115   : > { %v525_v63 = vmax.f32 %v449_v59, 0.0 }
 0x116   : > { %v549_v0 = vpack.c.bf16 %v527_v61, %v526_v60 }
 0x117   : > { %v548_v1 = vpack.c.bf16 %v525_v63, %v524_v62  ;;  %v1005_v2 = vpop.f32.mrb[20].mxu0 }
 0x118   : > { %v470_v3 = vadd.f32 %v1005_v2, %v1362_v58  ;;  %v461_v4 = vpop.f32.mrb[21].mxu0 }
 0x119   : > { %v462_v5 = vadd.f32 %v1362_v58, %v461_v4  ;;  %v1006_v6 = vpop.f32.mrb[22].mxu0  ;;  %1047 = vmatprep.mubr.bf16.mxu1 %v548_v1 }
 0x11a   : > { %v473_v7 = vadd.f32 %v1006_v6, %v1362_v58  ;;  %v464_v8 = vpop.f32.mrb[23].mxu0  ;;  %1048 = vmatmul.mubr.bf16.gmra.mrb[12].mxu1 %v549_v0  ;;  %v530_v10 = vmax.f32 %v470_v3, 0.0 }
 0x11b   : > { %v465_v9 = vadd.f32 %v1362_v58, %v464_v8  ;;  %v528_v12 = vmax.f32 %v462_v5, 0.0 }
 0x11c   : > { %v531_v11 = vmax.f32 %v473_v7, 0.0 }
 0x11d   : > { %v529_v13 = vmax.f32 %v465_v9, 0.0 }
 0x11e   : > { %v551_v14 = vpack.c.bf16 %v531_v11, %v530_v10 }
 0x11f   : > { %v550_v15 = vpack.c.bf16 %v529_v13, %v528_v12  ;;  %v1009_v16 = vpop.f32.mrb[24].mxu0 }
 0x120   : > { %v486_v17 = vadd.f32 %v1009_v16, %v1362_v58  ;;  %v477_v18 = vpop.f32.mrb[25].mxu0 }
 0x121   : > { %v478_v19 = vadd.f32 %v1362_v58, %v477_v18  ;;  %v1010_v20 = vpop.f32.mrb[26].mxu0  ;;  %1051 = vmatprep.mubr.bf16.mxu1 %v550_v15 }
 0x122   : > { %v489_v21 = vadd.f32 %v1010_v20, %v1362_v58  ;;  %v480_v22 = vpop.f32.mrb[27].mxu0  ;;  %1052 = vmatmul.mubr.bf16.gmra.mrb[16].mxu1 %v551_v14  ;;  %v534_v24 = vmax.f32 %v486_v17, 0.0 }
 0x123   : > { %v481_v23 = vadd.f32 %v1362_v58, %v480_v22  ;;  %v532_v26 = vmax.f32 %v478_v19, 0.0 }
 0x124   : > { %v535_v25 = vmax.f32 %v489_v21, 0.0 }
 0x125   : > { %v533_v27 = vmax.f32 %v481_v23, 0.0 }
 0x126   : > { %v553_v28 = vpack.c.bf16 %v535_v25, %v534_v24 }
 0x127   : > { %v552_v29 = vpack.c.bf16 %v533_v27, %v532_v26  ;;  %v1013_v30 = vpop.f32.mrb[28].mxu0 }
 0x128   : > { %v502_v31 = vadd.f32 %v1013_v30, %v1362_v58  ;;  %v493_v32 = vpop.f32.mrb[29].mxu0 }
 0x129   : > { %v494_v33 = vadd.f32 %v1362_v58, %v493_v32  ;;  %v1014_v34 = vpop.f32.mrb[30].mxu0  ;;  %1055 = vmatprep.mubr.bf16.mxu1 %v552_v29 }
 0x12a   : > { %v505_v35 = vadd.f32 %v1014_v34, %v1362_v58  ;;  %v496_v36 = vpop.f32.mrb[31].mxu0  ;;  %1056 = vmatmul.mubr.bf16.gmra.mrb[20].mxu1 %v553_v28  ;;  %v538_v38 = vmax.f32 %v502_v31, 0.0 }
 0x12b   : > { %v497_v37 = vadd.f32 %v1362_v58, %v496_v36  ;;  %v536_v40 = vmax.f32 %v494_v33, 0.0 }
 0x12c   : > { %v539_v39 = vmax.f32 %v505_v35, 0.0 }
 0x12d   : > { %v537_v41 = vmax.f32 %v497_v37, 0.0 }
 0x12e   : > { %v555_v42 = vpack.c.bf16 %v539_v39, %v538_v38 }
 0x12f   : > { %v554_v43 = vpack.c.bf16 %v537_v41, %v536_v40 }
 0x131   : > { %1059 = vmatprep.mubr.bf16.mxu1 %v554_v43 }
 0x132   : > { %1060 = vmatmul.mubr.bf16.gmra.mrb[24].mxu1 %v555_v42 }
 0x1cd   : > { %v1033_v45 = vpop.f32.mrb[32].mxu0 }
 0x1ce   : > { %v670_v46 = vadd.f32 %v1033_v45, %v1402_v44  ;;  %v661_v58 = vpop.f32.mrb[33].mxu0 }
 0x1cf   : > { %v662_v47 = vadd.f32 %v1402_v44, %v661_v58  ;;  %v1034_v48 = vpop.f32.mrb[34].mxu0 }
 0x1d0   : > { %790 = vst [vmem:[%s1406_s26 + $0x10] sm:$0xff] %v670_v46  ;;  %v673_v49 = vadd.f32 %v1034_v48, %v1402_v44  ;;  %v664_v50 = vpop.f32.mrb[35].mxu0 }
 0x1d1   : > { %788 = vst [vmem:[%s1406_s26] sm:$0xff] %v662_v47  ;;  %v665_v51 = vadd.f32 %v1402_v44, %v664_v50 }
 0x1d2   : > { %791 = vst [vmem:[%s1406_s26 + $0x18] sm:$0xff] %v673_v49 }
 0x1d3   : > { %789 = vst [vmem:[%s1406_s26 + $0x8] sm:$0xff] %v665_v51 }
 0x1d5   : > { %v1037_v52 = vpop.f32.mrb[0].mxu1 }
 0x1d6   : > { %v686_v53 = vadd.f32 %v1037_v52, %v1402_v44  ;;  %v677_v54 = vpop.f32.mrb[1].mxu1 }
 0x1d7   : > { %v678_v55 = vadd.f32 %v1402_v44, %v677_v54  ;;  %v1038_v56 = vpop.f32.mrb[2].mxu1 }
 0x1d8   : > { %794 = vst [vmem:[%s1406_s26 + $0x30] sm:$0xff] %v686_v53  ;;  %v689_v57 = vadd.f32 %v1038_v56, %v1402_v44  ;;  %v680_v59 = vpop.f32.mrb[3].mxu1 }
 0x1d9   : > { %792 = vst [vmem:[%s1406_s26 + $0x20] sm:$0xff] %v678_v55  ;;  %v681_v60 = vadd.f32 %v1402_v44, %v680_v59 }
 0x1da   : > { %795 = vst [vmem:[%s1406_s26 + $0x38] sm:$0xff] %v689_v57 }
 0x1db   : > { %793 = vst [vmem:[%s1406_s26 + $0x28] sm:$0xff] %v681_v60 }
 0x1dd   : > { %v1041_v61 = vpop.f32.mrb[4].mxu1 }
 0x1de   : > { %v702_v62 = vadd.f32 %v1041_v61, %v1402_v44  ;;  %v693_v63 = vpop.f32.mrb[5].mxu1 }
 0x1df   : > { %v694_v0 = vadd.f32 %v1402_v44, %v693_v63  ;;  %v1042_v1 = vpop.f32.mrb[6].mxu1 }
 0x1e0   : > { %798 = vst [vmem:[%s1406_s26 + $0x50] sm:$0xff] %v702_v62  ;;  %v705_v2 = vadd.f32 %v1042_v1, %v1402_v44  ;;  %v696_v3 = vpop.f32.mrb[7].mxu1 }
 0x1e1   : > { %796 = vst [vmem:[%s1406_s26 + $0x40] sm:$0xff] %v694_v0  ;;  %v697_v4 = vadd.f32 %v1402_v44, %v696_v3 }
 0x1e2   : > { %799 = vst [vmem:[%s1406_s26 + $0x58] sm:$0xff] %v705_v2 }
 0x1e3   : > { %797 = vst [vmem:[%s1406_s26 + $0x48] sm:$0xff] %v697_v4 }
 0x1e5   : > { %v1045_v5 = vpop.f32.mrb[8].mxu1 }
 0x1e6   : > { %v718_v6 = vadd.f32 %v1045_v5, %v1402_v44  ;;  %v709_v7 = vpop.f32.mrb[9].mxu1 }
 0x1e7   : > { %v710_v8 = vadd.f32 %v1402_v44, %v709_v7  ;;  %v1046_v9 = vpop.f32.mrb[10].mxu1 }
 0x1e8   : > { %802 = vst [vmem:[%s1406_s26 + $0x70] sm:$0xff] %v718_v6  ;;  %v721_v10 = vadd.f32 %v1046_v9, %v1402_v44  ;;  %v712_v11 = vpop.f32.mrb[11].mxu1 }
 0x1e9   : > { %800 = vst [vmem:[%s1406_s26 + $0x60] sm:$0xff] %v710_v8  ;;  %v713_v12 = vadd.f32 %v1402_v44, %v712_v11 }
 0x1ea   : > { %803 = vst [vmem:[%s1406_s26 + $0x78] sm:$0xff] %v721_v10 }
 0x1eb   : > { %801 = vst [vmem:[%s1406_s26 + $0x68] sm:$0xff] %v713_v12 }
 0x1ed   : > { %v1049_v13 = vpop.f32.mrb[12].mxu1 }
 0x1ee   : > { %v734_v14 = vadd.f32 %v1049_v13, %v1402_v44  ;;  %v725_v15 = vpop.f32.mrb[13].mxu1 }
 0x1ef   : > { %v726_v16 = vadd.f32 %v1402_v44, %v725_v15  ;;  %v1050_v17 = vpop.f32.mrb[14].mxu1 }
 0x1f0   : > { %806 = vst [vmem:[%s1406_s26 + $0x90] sm:$0xff] %v734_v14  ;;  %v737_v18 = vadd.f32 %v1050_v17, %v1402_v44  ;;  %v728_v19 = vpop.f32.mrb[15].mxu1 }
 0x1f1   : > { %804 = vst [vmem:[%s1406_s26 + $0x80] sm:$0xff] %v726_v16  ;;  %v729_v20 = vadd.f32 %v1402_v44, %v728_v19 }
 0x1f2   : > { %807 = vst [vmem:[%s1406_s26 + $0x98] sm:$0xff] %v737_v18 }
 0x1f3   : > { %805 = vst [vmem:[%s1406_s26 + $0x88] sm:$0xff] %v729_v20 }
 0x1f5   : > { %v1053_v21 = vpop.f32.mrb[16].mxu1 }
 0x1f6   : > { %v750_v22 = vadd.f32 %v1053_v21, %v1402_v44  ;;  %v741_v23 = vpop.f32.mrb[17].mxu1 }
 0x1f7   : > { %v742_v24 = vadd.f32 %v1402_v44, %v741_v23  ;;  %v1054_v25 = vpop.f32.mrb[18].mxu1 }
 0x1f8   : > { %810 = vst [vmem:[%s1406_s26 + $0xb0] sm:$0xff] %v750_v22  ;;  %v753_v26 = vadd.f32 %v1054_v25, %v1402_v44  ;;  %v744_v27 = vpop.f32.mrb[19].mxu1 }
 0x1f9   : > { %808 = vst [vmem:[%s1406_s26 + $0xa0] sm:$0xff] %v742_v24  ;;  %v745_v28 = vadd.f32 %v1402_v44, %v744_v27 }
 0x1fa   : > { %811 = vst [vmem:[%s1406_s26 + $0xb8] sm:$0xff] %v753_v26 }
 0x1fb   : > { %809 = vst [vmem:[%s1406_s26 + $0xa8] sm:$0xff] %v745_v28 }
 0x1fd   : > { %v1057_v29 = vpop.f32.mrb[20].mxu1 }
 0x1fe   : > { %v766_v30 = vadd.f32 %v1057_v29, %v1402_v44  ;;  %v757_v31 = vpop.f32.mrb[21].mxu1 }
 0x1ff   : > { %v758_v32 = vadd.f32 %v1402_v44, %v757_v31  ;;  %v1058_v33 = vpop.f32.mrb[22].mxu1 }
 0x200   : > { %814 = vst [vmem:[%s1406_s26 + $0xd0] sm:$0xff] %v766_v30  ;;  %v769_v34 = vadd.f32 %v1058_v33, %v1402_v44  ;;  %v760_v35 = vpop.f32.mrb[23].mxu1 }
 0x201   : > { %812 = vst [vmem:[%s1406_s26 + $0xc0] sm:$0xff] %v758_v32  ;;  %v761_v36 = vadd.f32 %v1402_v44, %v760_v35 }
 0x202   : > { %815 = vst [vmem:[%s1406_s26 + $0xd8] sm:$0xff] %v769_v34 }
 0x203   : > { %813 = vst [vmem:[%s1406_s26 + $0xc8] sm:$0xff] %v761_v36 }
 0x205   : > { %v1061_v37 = vpop.f32.mrb[24].mxu1 }
 0x206   : > { %v782_v38 = vadd.f32 %v1061_v37, %v1402_v44  ;;  %v773_v39 = vpop.f32.mrb[25].mxu1 }
 0x207   : > { %v774_v40 = vadd.f32 %v1402_v44, %v773_v39  ;;  %v1062_v41 = vpop.f32.mrb[26].mxu1 }
 0x208   : > { %818 = vst [vmem:[%s1406_s26 + $0xf0] sm:$0xff] %v782_v38  ;;  %v785_v42 = vadd.f32 %v1062_v41, %v1402_v44  ;;  %v776_v43 = vpop.f32.mrb[27].mxu1 }
 0x209   : > { %816 = vst [vmem:[%s1406_s26 + $0xe0] sm:$0xff] %v774_v40  ;;  %v777_v45 = vadd.f32 %v1402_v44, %v776_v43 }
 0x20a   : > { %819 = vst [vmem:[%s1406_s26 + $0xf8] sm:$0xff] %v785_v42 }
 0x20b   : > { %817 = vst [vmem:[%s1406_s26 + $0xe8] sm:$0xff] %v777_v45 }
 0x20c   : > { %1143 = shalt.err (!%p1140_p3)
}
 0x20d   : > { %s1144_s14 = scalar_lea.hbm %s1471_s9, 4096  ;;  %s1148_s17 = scalar_lea.hbm %s1527_s5, 8192 }
 0x20e   : > { %p1145_p4 = scmp.ne.s32.totalorder %s1471_s9, %s1144_s14  ;;  %p1149_p9 = scmp.lt.u32.totalorder %s1471_s9, %s1527_s5 }
 0x20f   : > { %p1150_p10 = scmp.lt.u32.totalorder %s1148_s17, %s1144_s14  ;;  %p1152_p12 = scmp.lt.u32.totalorder %s1144_s14, %s1471_s9 }
 0x210   : > { %p1146_p7 = pnand %p1145_p4, %p1265_p5 }
 0x211   : > { %p1151_p11 = por %p1150_p10, %p1149_p9 }
 0x212   : > { %p1147_p8 = pneg %p1146_p7 }
 0x213   : > { %p1153_p13 = por %p1152_p12, %p1151_p11 }
 0x215   : > { %p1154_p0 = pnand %p1153_p13, %p1147_p8 }
 0x217   : > { %1157 = shalt.err (!%p1154_p0)
}
 0x218   : > { %s1195_s26 = smov 128   ;;  %s1196_s30 = smov 8  }
 0x219   : > { %1079 = dma.vmem_to_hbm [thread:$0]  (%p1265_p5), %s1473_s6, 4096, %s1471_s9, %s1481_s22, %s1195_s26, %s1195_s26, %s1196_s30  }
 0x21a PF: > { %p1085_p1 = scmp.ge.s32.totalorder %s1192_s21, 2  ;;  %s849_s7 = sand.u32 1, %s1180_s18  }
 0x21b   : > { %s850_s8 = scalar_lea.sflag [#allocation3], %s849_s7 }
 0x21c   : > { %p1082_p2 = pnand %p1085_p1, %p1269_p6 }
 0x21e   : > { %1175 = dma.done.wait (!%p1082_p2), %s850_s8, 4096  }
 0x21f   : > { %1177 = vsyncadd (!%p1082_p2), %s850_s8, 4294963200  ;;  %p15_p3 = scmp.ge.s32.totalorder %s1252_s24, 4   ;;  %s1530_s18 = smov %s1184_s19 }
 0x220   : > { %s1531_s19 = smov %s1188_s20  ;;  %s1532_s20 = smov %s1263_s27 }
 0x221   : > { %s1533_s21 = smov %s1252_s24  ;;  %17 = sbr.rel (!%p15_p3) target bundleno = 3 (0x3), region = 75 }
 0x228   :  { %855 = vsyncpa [#allocation3], 1 }
 0x229   :  { %857 = vsyncpa [#allocation3 + $0x1], 1 }

</bundles_post_ra>
